<compile_context>
chip_gen: v7x
topology: tpu7x:2x2x1
jax: 0.10.0
libtpu: 0.0.40
codegen_flags: <defaults>
</compile_context>

<pallas_src>
import jax
import jax.numpy as jnp
from jax.experimental import pallas as pl
from jax.experimental.pallas import tpu as pltpu


def _round_up(x, m):
    return (x + m - 1) // m * m


def _default_hidden_dtype():
    """bf16 bias-add/ReLU on chips with a bf16 VALU (v6e/v7x); f32 on v5e/older.
    Perf-only choice — both dtypes are numerically valid on every chip."""
    try:
        kind = jax.devices()[0].device_kind.lower()
    except Exception:
        return jnp.bfloat16
    if any(v in kind for v in ("v2", "v3", "v4", "v5")):
        return jnp.float32
    return jnp.bfloat16


# --------------------------------------------------------------------------- #
# Kernel
# --------------------------------------------------------------------------- #
def _mlp_kernel(x_ref, w1_ref, b1_ref, w2_ref, b2_ref, w3_ref, b3_ref, out_ref):
    hid_dt = b1_ref.dtype  # bf16 (v6e/v7x) or f32 (v5e) — chosen in fold_params()

    # bn0 folded into fc1; cast x to bf16 for the MXU (no-op if already bf16)
    x = x_ref[...].astype(jnp.bfloat16)
    h1 = jnp.dot(x, w1_ref[...], preferred_element_type=jnp.float32)
    h1 = jnp.maximum(h1.astype(hid_dt) + b1_ref[...], 0.0).astype(jnp.bfloat16)

    # fc2 (post-ReLU bn1 folded in; do1 == identity in eval) -> bias -> relu
    h2 = jnp.dot(h1, w2_ref[...], preferred_element_type=jnp.float32)
    h2 = jnp.maximum(h2.astype(hid_dt) + b2_ref[...], 0.0).astype(jnp.bfloat16)

    # fc3 (post-ReLU bn2 folded in; do2 == identity), lane-padded classes
    out_ref[...] = (jnp.dot(h2, w3_ref[...], preferred_element_type=jnp.float32)
                    + b3_ref[...]).astype(out_ref.dtype)


# --------------------------------------------------------------------------- #
# Parameter folding
# --------------------------------------------------------------------------- #
def fold_params(params, n_classes, hidden_dtype=None):
    """Fold eval-mode BN affines into the consuming Linear layers, cast weights
    to bf16, and zero-pad fc3 out to a 128-lane multiple."""
    if hidden_dtype is None:
        hidden_dtype = _default_hidden_dtype()

    s0, t0 = params["s0"], params["t0"]
    s1, t1 = params["s1"], params["t1"]
    s2, t2 = params["s2"], params["t2"]
    w1, b1 = params["w1"], params["b1"]
    w2, b2 = params["w2"], params["b2"]
    w3, b3 = params["w3"], params["b3"]

    # fc(bn(y)) = (y*s + t) @ W + b = y @ (s^T * W) + (t @ W + b)
    w1f, b1f = s0.T * w1, b1 + t0 @ w1   # bn0 -> fc1
    w2f, b2f = s1.T * w2, b2 + t1 @ w2   # bn1 -> fc2  (bn1 sits after relu(fc1))
    w3f, b3f = s2.T * w3, b3 + t2 @ w3   # bn2 -> fc3  (bn2 sits after relu(fc2))

    c_pad = _round_up(max(n_classes, 128), 128)
    w3f = jnp.pad(w3f, ((0, 0), (0, c_pad - n_classes)))
    b3f = jnp.pad(b3f, ((0, 0), (0, c_pad - n_classes)))

    return dict(
        w1=w1f.astype(jnp.bfloat16), b1=b1f.astype(hidden_dtype),
        w2=w2f.astype(jnp.bfloat16), b2=b2f.astype(hidden_dtype),
        w3=w3f.astype(jnp.bfloat16), b3=b3f.astype(jnp.float32),
    )


# --------------------------------------------------------------------------- #
# Tile-size / VMEM sizing
# --------------------------------------------------------------------------- #
def _vmem_footprint(f, h1, h2, c_pad, x_itemsize, hid_itemsize, out_itemsize):
    """(fixed_bytes, per_batch_row_bytes) estimate of the kernel's VMEM set."""
    per_row = (2 * f * x_itemsize                 # double-buffered x tile
               + 2 * c_pad * out_itemsize         # double-buffered out tile
               + (h1 + h2) * (4 + hid_itemsize)   # f32 MXU accs + hidden acts
               + c_pad * 4)                       # final f32 accumulator
    fixed = 2 * 2 * (f * h1 + h1 * h2 + h2 * c_pad)        # bf16 weights (x2 buf)
    fixed += 2 * (hid_itemsize * (h1 + h2) + 4 * c_pad)    # biases
    return fixed, per_row


def _pick_batch_tile(n, fixed, per_row, budget_bytes, tm_max=2048):
    tm = (budget_bytes - fixed) // per_row
    tm = max(8, min(tm_max, int(tm)))
    tm = (tm // 8) * 8
    # Keep >= 2 grid steps when the batch allows it so the "parallel" axis can
    # be sharded across both TensorCores on v7x (v5e/v6e single-TC unaffected).
    if n > 16:
        tm = min(tm, _round_up(pl.cdiv(n, 2), 8))
    return max(8, min(tm, _round_up(n, 8)))


# --------------------------------------------------------------------------- #
# Wrapper
# --------------------------------------------------------------------------- #
def shape_classifier_mlp(x, fp, n_classes, *, tm=None,
                         logits_dtype=jnp.bfloat16,
                         vmem_budget_bytes=20 << 20):
    """Eval-mode forward.  x: [N, F] float32 or bfloat16 (no wrapper-side cast or
    pad is performed).  fp: folded/padded params from fold_params().
    Returns [N, n_classes] logits in `logits_dtype`."""
    n, f = x.shape
    h1 = fp["w1"].shape[1]
    h2 = fp["w2"].shape[1]
    c_pad = fp["w3"].shape[1]

    fixed, per_row = _vmem_footprint(
        f, h1, h2, c_pad,
        x_itemsize=jnp.dtype(x.dtype).itemsize,
        hid_itemsize=jnp.dtype(fp["b1"].dtype).itemsize,
        out_itemsize=jnp.dtype(logits_dtype).itemsize)

    if tm is None:
        tm = _pick_batch_tile(n, fixed, per_row, vmem_budget_bytes)
    else:
        tm = max(8, min(_round_up(tm, 8), _round_up(n, 8)))

    # Scoped-VMEM request: 2x the accounted working set, clamped to a range
    # that is >= the v5e 16 MiB default and <= v7x's 64 MiB physical VMEM.
    vmem_limit = int(min(48 << 20, max(32 << 20, 2 * (fixed + tm * per_row))))

    def resident(shape):  # weights/biases: same block every grid step (VMEM-resident)
        return pl.BlockSpec(shape, lambda i: (0, 0))

    out = pl.pallas_call(
        _mlp_kernel,
        out_shape=jax.ShapeDtypeStruct((n, c_pad), logits_dtype),
        grid=(pl.cdiv(n, tm),),
        in_specs=[
            pl.BlockSpec((tm, f), lambda i: (i, 0)),   # x batch tile (ragged-tail OK)
            resident((f, h1)),                          # w1 (bf16)
            resident((1, h1)),                          # b1 (hidden dtype)
            resident((h1, h2)),                         # w2 (bf16)
            resident((1, h2)),                          # b2 (hidden dtype)
            resident((h2, c_pad)),                      # w3 (bf16, lane-padded)
            resident((1, c_pad)),                       # b3 (f32, lane-padded)
        ],
        out_specs=pl.BlockSpec((tm, c_pad), lambda i: (i, 0)),
        compiler_params=pltpu.CompilerParams(
            dimension_semantics=("parallel",),
            vmem_limit_bytes=vmem_limit),
    )(x, fp["w1"], fp["b1"], fp["w2"], fp["b2"], fp["w3"], fp["b3"])

    return out[:, :n_classes]


# --------------------------------------------------------------------------- #
# Synthetic parameters + references
# --------------------------------------------------------------------------- #
def make_params(key, n_features, n_classes, hsize1=512, hsize2=512, eps=1e-5):
    """Deterministic synthetic parameters with PyTorch-module shapes; BN stored
    as eval-mode per-feature scale/shift."""
    ks = jax.random.split(key, 18)

    def linear(kw, kb, fan_in, fan_out):
        bound = 1.0 / jnp.sqrt(fan_in)
        w = jax.random.uniform(kw, (fan_in, fan_out), jnp.float32, -bound, bound)
        b = jax.random.uniform(kb, (1, fan_out), jnp.float32, -bound, bound)
        return w, b

    def bn(kg, kb, km, kv, dim):
        gamma = 1.0 + 0.1 * jax.random.normal(kg, (1, dim), jnp.float32)
        beta = 0.1 * jax.random.normal(kb, (1, dim), jnp.float32)
        rmean = 0.1 * jax.random.normal(km, (1, dim), jnp.float32)
        rvar = 1.0 + 0.1 * jax.random.uniform(kv, (1, dim), jnp.float32)
        scale = gamma / jnp.sqrt(rvar + eps)
        shift = beta - rmean * scale
        return scale, shift

    s0, t0 = bn(ks[0], ks[1], ks[2], ks[3], n_features)
    w1, b1 = linear(ks[4], ks[5], n_features, hsize1)
    s1, t1 = bn(ks[6], ks[7], ks[8], ks[9], hsize1)
    w2, b2 = linear(ks[10], ks[11], hsize1, hsize2)
    s2, t2 = bn(ks[12], ks[13], ks[14], ks[15], hsize2)
    w3, b3 = linear(ks[16], ks[17], hsize2, n_classes)

    return dict(s0=s0, t0=t0, w1=w1, b1=b1, s1=s1, t1=t1,
                w2=w2, b2=b2, s2=s2, t2=t2, w3=w3, b3=b3)


def reference_forward_f32(x, p):
    """Pure-JAX f32 reference of the eval-mode PyTorch forward (no fold, no bf16)."""
    h = x * p["s0"] + p["t0"]
    h = jnp.maximum(h @ p["w1"] + p["b1"], 0.0) * p["s1"] + p["t1"]
    h = jnp.maximum(h @ p["w2"] + p["b2"], 0.0) * p["s2"] + p["t2"]
    return h @ p["w3"] + p["b3"]


def reference_forward_folded(x, fp, n_classes):
    """Pure-JAX reference mirroring the kernel's folded bf16 weights, f32 MXU
    accumulation and hidden dtype exactly."""
    hid_dt = fp["b1"].dtype
    h = jnp.dot(x.astype(jnp.bfloat16), fp["w1"], preferred_element_type=jnp.float32)
    h = jnp.maximum(h.astype(hid_dt) + fp["b1"], 0.0).astype(jnp.bfloat16)
    h = jnp.dot(h, fp["w2"], preferred_element_type=jnp.float32)
    h = jnp.maximum(h.astype(hid_dt) + fp["b2"], 0.0).astype(jnp.bfloat16)
    out = jnp.dot(h, fp["w3"], preferred_element_type=jnp.float32) + fp["b3"]
    return out[:, :n_classes]


if __name__ == "__main__":
    # Small, TPU-friendly demo shapes; auto-picked tm gives a 2-step batch grid.
    N, N_FEATURES, HSIZE1, HSIZE2, N_CLASSES = 512, 128, 128, 128, 16

    key = jax.random.PRNGKey(0)
    kx, kp = jax.random.split(key)
    x = jax.random.normal(kx, (N, N_FEATURES), jnp.float32)
    params = make_params(kp, N_FEATURES, N_CLASSES, hsize1=HSIZE1, hsize2=HSIZE2)
    fp = fold_params(params, N_CLASSES)

    out = shape_classifier_mlp(x, fp, N_CLASSES)
    out = jax.block_until_ready(out)
    assert out.shape == (N, N_CLASSES)
    out_f32 = out.astype(jnp.float32)

    # Tight check vs a JAX path using the identical folded weights / dtypes.
    ref_bf16 = reference_forward_folded(x, fp, N_CLASSES).astype(jnp.float32)
    assert jnp.allclose(out_f32, ref_bf16, atol=2e-2, rtol=2e-2), \
        "mismatch vs bf16-matched JAX reference"

    # Looser check vs the un-folded f32 eval-mode forward (bf16 quantization error).
    ref_f32 = reference_forward_f32(x, params)
    assert jnp.allclose(out_f32, ref_f32, atol=5e-2, rtol=5e-2), \
        "mismatch vs f32 eval-mode reference"

    # Ragged batch: exercises the no-pad path (grid = cdiv(n, tm), masked tail write).
    n_ragged = 200
    out2 = jax.block_until_ready(shape_classifier_mlp(x[:n_ragged], fp, N_CLASSES))
    assert out2.shape == (n_ragged, N_CLASSES)
    assert jnp.allclose(out2.astype(jnp.float32), ref_bf16[:n_ragged],
                        atol=2e-2, rtol=2e-2), "mismatch on ragged batch"

    print("KERNEL_OK")
</pallas_src>

<mosaic_0001>
module attributes {stable_mosaic.version = 11 : i64} {
  func.func @_mlp_kernel(%arg0: i32, %arg1: memref<256x128xf32, #tpu.memory_space<vmem>>, %arg2: memref<128x128xbf16, #tpu.memory_space<vmem>>, %arg3: memref<1x128xbf16, #tpu.memory_space<vmem>>, %arg4: memref<128x128xbf16, #tpu.memory_space<vmem>>, %arg5: memref<1x128xbf16, #tpu.memory_space<vmem>>, %arg6: memref<128x128xbf16, #tpu.memory_space<vmem>>, %arg7: memref<1x128xf32, #tpu.memory_space<vmem>>, %arg8: memref<256x128xbf16, #tpu.memory_space<vmem>>) attributes {dimension_semantics = [#tpu.dimension_semantics<parallel>], iteration_bounds = array<i64: 2>, scalar_prefetch = 0 : i64, scratch_operands = 0 : i64, tpu.core_type = #tpu.core_type<tc>, window_params = [{transform_indices = @transform_0, window_bounds = array<i64: 256, 128>}, {pipeline_mode = #tpu.pipeline_mode<synchronous>, transform_indices = @transform_1, window_bounds = array<i64: 128, 128>}, {pipeline_mode = #tpu.pipeline_mode<synchronous>, transform_indices = @transform_2, window_bounds = array<i64: 1, 128>}, {pipeline_mode = #tpu.pipeline_mode<synchronous>, transform_indices = @transform_3, window_bounds = array<i64: 128, 128>}, {pipeline_mode = #tpu.pipeline_mode<synchronous>, transform_indices = @transform_4, window_bounds = array<i64: 1, 128>}, {pipeline_mode = #tpu.pipeline_mode<synchronous>, transform_indices = @transform_5, window_bounds = array<i64: 128, 128>}, {pipeline_mode = #tpu.pipeline_mode<synchronous>, transform_indices = @transform_6, window_bounds = array<i64: 1, 128>}, {transform_indices = @transform_7, window_bounds = array<i64: 256, 128>}]} {
    %c0 = arith.constant 0 : index
    %c0_0 = arith.constant 0 : index
    %0 = vector.load %arg1[%c0, %c0_0] : memref<256x128xf32, #tpu.memory_space<vmem>>, vector<256x128xf32>
    %1 = arith.truncf %0 : vector<256x128xf32> to vector<256x128xbf16>
    %c0_1 = arith.constant 0 : index
    %c0_2 = arith.constant 0 : index
    %2 = vector.load %arg2[%c0_1, %c0_2] : memref<128x128xbf16, #tpu.memory_space<vmem>>, vector<128x128xbf16>
    %cst = arith.constant dense<0.000000e+00> : vector<256x128xf32>
    %3 = tpu.matmul %1, %2, %cst {dimension_numbers = #tpu.dot_dimension_numbers<[1], [0], [0], [1], [0, 0, 1, 1], [], []>} : vector<256x128xbf16>, vector<128x128xbf16>, vector<256x128xf32> -> vector<256x128xf32>
    %4 = arith.truncf %3 : vector<256x128xf32> to vector<256x128xbf16>
    %c0_3 = arith.constant 0 : index
    %c0_4 = arith.constant 0 : index
    %5 = vector.load %arg3[%c0_3, %c0_4] : memref<1x128xbf16, #tpu.memory_space<vmem>>, vector<1x128xbf16>
    %6 = vector.broadcast %5 : vector<1x128xbf16> to vector<256x128xbf16>
    %7 = arith.addf %4, %6 : vector<256x128xbf16>
    %cst_5 = arith.constant 0.000000e+00 : bf16
    %8 = vector.broadcast %cst_5 : bf16 to vector<256x128xbf16>
    %9 = arith.maximumf %7, %8 : vector<256x128xbf16>
    %c0_6 = arith.constant 0 : index
    %c0_7 = arith.constant 0 : index
    %10 = vector.load %arg4[%c0_6, %c0_7] : memref<128x128xbf16, #tpu.memory_space<vmem>>, vector<128x128xbf16>
    %cst_8 = arith.constant dense<0.000000e+00> : vector<256x128xf32>
    %11 = tpu.matmul %9, %10, %cst_8 {dimension_numbers = #tpu.dot_dimension_numbers<[1], [0], [0], [1], [0, 0, 1, 1], [], []>} : vector<256x128xbf16>, vector<128x128xbf16>, vector<256x128xf32> -> vector<256x128xf32>
    %12 = arith.truncf %11 : vector<256x128xf32> to vector<256x128xbf16>
    %c0_9 = arith.constant 0 : index
    %c0_10 = arith.constant 0 : index
    %13 = vector.load %arg5[%c0_9, %c0_10] : memref<1x128xbf16, #tpu.memory_space<vmem>>, vector<1x128xbf16>
    %14 = vector.broadcast %13 : vector<1x128xbf16> to vector<256x128xbf16>
    %15 = arith.addf %12, %14 : vector<256x128xbf16>
    %cst_11 = arith.constant 0.000000e+00 : bf16
    %16 = vector.broadcast %cst_11 : bf16 to vector<256x128xbf16>
    %17 = arith.maximumf %15, %16 : vector<256x128xbf16>
    %c0_12 = arith.constant 0 : index
    %c0_13 = arith.constant 0 : index
    %18 = vector.load %arg6[%c0_12, %c0_13] : memref<128x128xbf16, #tpu.memory_space<vmem>>, vector<128x128xbf16>
    %cst_14 = arith.constant dense<0.000000e+00> : vector<256x128xf32>
    %19 = tpu.matmul %17, %18, %cst_14 {dimension_numbers = #tpu.dot_dimension_numbers<[1], [0], [0], [1], [0, 0, 1, 1], [], []>} : vector<256x128xbf16>, vector<128x128xbf16>, vector<256x128xf32> -> vector<256x128xf32>
    %c0_15 = arith.constant 0 : index
    %c0_16 = arith.constant 0 : index
    %20 = vector.load %arg7[%c0_15, %c0_16] : memref<1x128xf32, #tpu.memory_space<vmem>>, vector<1x128xf32>
    %21 = vector.broadcast %20 : vector<1x128xf32> to vector<256x128xf32>
    %22 = arith.addf %19, %21 : vector<256x128xf32>
    %23 = arith.truncf %22 : vector<256x128xf32> to vector<256x128xbf16>
    %c0_17 = arith.constant 0 : index
    %c0_18 = arith.constant 0 : index
    %24 = vector.load %arg8[%c0_17, %c0_18] : memref<256x128xbf16, #tpu.memory_space<vmem>>, vector<256x128xbf16>
    tpu.vector_store %arg8[%c0_17, %c0_18], %23 {strides = array<i32>} : memref<256x128xbf16, #tpu.memory_space<vmem>>, vector<256x128xbf16>,
    return
  }
  func.func @transform_0(%arg0: i32) -> (i32, i32) {
    %c0_i32 = arith.constant 0 : i32
    %c0_i32_0 = arith.constant 0 : i32
    return %arg0, %c0_i32 : i32, i32
  }
  func.func @transform_1(%arg0: i32) -> (i32, i32) {
    %c0_i32 = arith.constant 0 : i32
    %c0_i32_0 = arith.constant 0 : i32
    %c0_i32_1 = arith.constant 0 : i32
    return %c0_i32, %c0_i32_0 : i32, i32
  }
  func.func @transform_2(%arg0: i32) -> (i32, i32) {
    %c0_i32 = arith.constant 0 : i32
    %c0_i32_0 = arith.constant 0 : i32
    %c0_i32_1 = arith.constant 0 : i32
    return %c0_i32, %c0_i32_0 : i32, i32
  }
  func.func @transform_3(%arg0: i32) -> (i32, i32) {
    %c0_i32 = arith.constant 0 : i32
    %c0_i32_0 = arith.constant 0 : i32
    %c0_i32_1 = arith.constant 0 : i32
    return %c0_i32, %c0_i32_0 : i32, i32
  }
  func.func @transform_4(%arg0: i32) -> (i32, i32) {
    %c0_i32 = arith.constant 0 : i32
    %c0_i32_0 = arith.constant 0 : i32
    %c0_i32_1 = arith.constant 0 : i32
    return %c0_i32, %c0_i32_0 : i32, i32
  }
  func.func @transform_5(%arg0: i32) -> (i32, i32) {
    %c0_i32 = arith.constant 0 : i32
    %c0_i32_0 = arith.constant 0 : i32
    %c0_i32_1 = arith.constant 0 : i32
    return %c0_i32, %c0_i32_0 : i32, i32
  }
  func.func @transform_6(%arg0: i32) -> (i32, i32) {
    %c0_i32 = arith.constant 0 : i32
    %c0_i32_0 = arith.constant 0 : i32
    %c0_i32_1 = arith.constant 0 : i32
    return %c0_i32, %c0_i32_0 : i32, i32
  }
  func.func @transform_7(%arg0: i32) -> (i32, i32) {
    %c0_i32 = arith.constant 0 : i32
    %c0_i32_0 = arith.constant 0 : i32
    return %arg0, %c0_i32 : i32, i32
  }
}

</mosaic_0001>

<bundles_post_ra>
// kernel: tpu_custom_call.1
= control target key start
LH: loop header
LB: loop body
LE: loop exit
PB: predicated region body
PF: predicated region fallthrough
CT: control target
= control target key end

     0   :  { %12 = vsyncpa [#allocation3], 0  ;;  %s2702_s0 = inlined_call_operand.hbm [shape: f32[512,128], index: 0, kind: input, shape index: {}]   ;;  %s2703_s1 = inlined_call_operand.hbm [shape: bf16[128,128], index: 1, kind: input, shape index: {}]   ;;  %s2704_s2 = inlined_call_operand.vmem [shape: bf16[1,128], index: 2, kind: input, shape index: {}]   ;;  %s2705_s3 = inlined_call_operand.hbm [shape: bf16[128,128], index: 3, kind: input, shape index: {}]   ;;  %s2706_s4 = inlined_call_operand.vmem [shape: bf16[1,128], index: 4, kind: input, shape index: {}]   ;;  %s2707_s5 = inlined_call_operand.hbm [shape: bf16[128,128], index: 5, kind: input, shape index: {}]   ;;  %s2708_s6 = inlined_call_operand.vmem [shape: f32[1,128], index: 6, kind: input, shape index: {}]   ;;  %s2709_s7 = inlined_call_operand.hbm [shape: bf16[512,128], index: 7, kind: output, shape index: {}]  }
   0x1   :  { %14 = vsyncpa [#allocation3 + $0x1], 0 }
   0x2   :  { %15 = vsyncpa [#allocation6], 0 }
   0x3   :  { %16 = vsyncpa [#allocation9], 0 }
   0x4   :  { %17 = vsyncpa [#allocation4], 0 }
   0x5   :  { %19 = vsyncpa [#allocation4 + $0x1], 0  ;;  %s2250_s24 = smov 0   ;;  %s2252_s25 = smov 0  }
   0x6   :  { %s2254_s26 = smov 0   ;;  %s2256_s27 = smov 0  }
   0x7 LB: > { %s2271_s28 = sadd.s32 4294967295, %s2196_s27   ;;  %s1462_s29 = sadd.s32 4294967294, %s2196_s27   ;;  %s2196_s27 = sphi %s2256_s27, %s2735_s27   ;;  %s2192_s26 = sphi %s2254_s26, %s2734_s26   ;;  %s2188_s25 = sphi %s2252_s25, %s2733_s25   ;;  %s2184_s24 = sphi %s2250_s24, %s2732_s24  }
   0x8   : > { %p45_p0 = scmp.ne.s32.totalorder %s2188_s25, %s2184_s24  ;;  %p2710_p1 = scmp.eq.s32.totalorder %s2271_s28, 0 }
   0x9   : > { %p201_p3 = scmp.eq.s32.totalorder %s1462_s29, 1  ;;  %p1463_p5 = scmp.ge.s32.totalorder %s2196_s27, 1 }
   0xa   : > { %p2280_p4 = por %p2710_p1, %p45_p0  ;;  %p208_p7 = scmp.lt.s32.totalorder %s2196_s27, 3 }
   0xb   : > { %p2285_p6 = por %p201_p3, %p45_p0  ;;  %s2198_s10 = smov [#allocation5]  }
   0xc   : > { %s2714_s30 = scalar_select %p2280_p4, 1, 0 }
   0xd   : > { %s2715_s8 = scalar_select %p2285_p6, 1, 0 }
   0xe   : > { %p2290_p8 = pnand %p1463_p5, %p208_p7  ;;  %s220_s11 = sshll.u32 %s2198_s10, 4  ;;  %s2294_s11 = int_to_ptr.vmem [resolvable:$true] %s220_s11 }
   0xf   : > { %2716 = sst [smem:[#allocation15_spill]] %s2715_s8  ;;  %s2199_s13 = smov [#allocation7]  }
  0x10   : > { %s2717_s9 = scalar_select %p2290_p8, 1, 0 }
  0x11   : > { %p1916_p9 = pneg %p2290_p8  ;;  %s236_s14 = sshll.u32 %s2199_s13, 4  ;;  %s2305_s14 = int_to_ptr.vmem [resolvable:$true] %s236_s14 }
  0x12   : > { %s2200_s15 = smov [#allocation8]   ;;  %s2008_s19 = scalar_lea.hbm %s2703_s1, 1024 }
  0x13   : > { %p2301_p11 = pnand %p1916_p9, %p2710_p1  ;;  %s2307_s16 = sshll.u32 %s2200_s15, 4  ;;  %s253_s16 = int_to_ptr.vmem [resolvable:$true] %s2307_s16 }
  0x14   : > { %p2009_p12 = scmp.ne.s32.totalorder %s2703_s1, %s2008_s19  ;;  %p2015_p5 = scmp.lt.u32.totalorder %s2008_s19, %s2703_s1 }
  0x15   : > { %p2317_p13 = pneg %p2301_p11 }
  0x17   : > { %p2011_p0 = pnand %p2317_p13, %p2009_p12 }
  0x19   : > { %p2012_p3 = pneg %p2011_p0 }
  0x1b   : > { %p2017_p7 = pnand %p2015_p5, %p2012_p3 }
  0x1d   : > { %2020 = shalt.err (!%p2017_p7)
}
  0x1e   : > { %s2021_s10 = scalar_lea.vmem %s2294_s11, 1024  ;;  %p2029_p2 = scmp.lt.s32.totalorder %s2294_s11, %s2294_s11 }
  0x1f   : > { %p2022_p9 = scmp.ne.s32.totalorder %s2294_s11, %s2021_s10  ;;  %p2030_p6 = scmp.lt.s32.totalorder %s2021_s10, %s2021_s10 }
  0x21   : > { %p2024_p10 = pnand %p2022_p9, %p2317_p13  ;;  %p2031_p12 = por %p2030_p6, %p2029_p2 }
  0x23   : > { %p2025_p1 = pneg %p2024_p10 }
  0x25   : > { %p2032_p0 = pnand %p2031_p12, %p2025_p1 }
  0x27   : > { %2035 = shalt.err (!%p2032_p0)
}
  0x28   : > { %s2201_s13 = smov 64   ;;  %s2202_s15 = smov 4  }
  0x29   : > { %1919 = dma.hbm_to_vmem [thread:$0]  (!%p2301_p11), %s2703_s1, 1024, %s2294_s11, [#allocation6], %s2201_s13, %s2201_s13, %s2202_s15  }
  0x2a   : > { %s2036_s21 = scalar_lea.hbm %s2705_s3, 1024 }
  0x2b   : > { %p2037_p1 = scmp.ne.s32.totalorder %s2705_s3, %s2036_s21  ;;  %p2043_p10 = scmp.lt.u32.totalorder %s2036_s21, %s2705_s3 }
  0x2d   : > { %p2039_p2 = pnand %p2037_p1, %p2317_p13 }
  0x2f   : > { %p2040_p6 = pneg %p2039_p2 }
  0x31   : > { %p2045_p3 = pnand %p2043_p10, %p2040_p6 }
  0x33   : > { %2048 = shalt.err (!%p2045_p3)
}
  0x34   : > { %s2049_s11 = scalar_lea.vmem %s2305_s14, 1024  ;;  %p2057_p12 = scmp.lt.s32.totalorder %s2305_s14, %s2305_s14 }
  0x35   : > { %p2050_p5 = scmp.ne.s32.totalorder %s2305_s14, %s2049_s11  ;;  %p2058_p0 = scmp.lt.s32.totalorder %s2049_s11, %s2049_s11 }
  0x37   : > { %p2052_p7 = pnand %p2050_p5, %p2317_p13  ;;  %p2059_p1 = por %p2058_p0, %p2057_p12 }
  0x39   : > { %p2053_p9 = pneg %p2052_p7 }
  0x3b   : > { %p2060_p2 = pnand %p2059_p1, %p2053_p9 }
  0x3d   : > { %2063 = shalt.err (!%p2060_p2)
}
  0x3e   : > { %1922 = dma.hbm_to_vmem [thread:$0]  (!%p2301_p11), %s2705_s3, 1024, %s2305_s14, [#allocation6], %s2201_s13, %s2201_s13, %s2202_s15  }
  0x3f   : > { %s2064_s20 = scalar_lea.hbm %s2707_s5, 1024 }
  0x40   : > { %p2065_p6 = scmp.ne.s32.totalorder %s2707_s5, %s2064_s20  ;;  %p2071_p5 = scmp.lt.u32.totalorder %s2064_s20, %s2707_s5 }
  0x42   : > { %p2067_p10 = pnand %p2065_p6, %p2317_p13 }
  0x44   : > { %p2068_p3 = pneg %p2067_p10 }
  0x46   : > { %p2073_p7 = pnand %p2071_p5, %p2068_p3 }
  0x48   : > { %2076 = shalt.err (!%p2073_p7)
}
  0x49   : > { %s2077_s11 = scalar_lea.vmem %s253_s16, 1024  ;;  %p2085_p1 = scmp.lt.s32.totalorder %s253_s16, %s253_s16 }
  0x4a   : > { %p2078_p9 = scmp.ne.s32.totalorder %s253_s16, %s2077_s11  ;;  %p2086_p2 = scmp.lt.s32.totalorder %s2077_s11, %s2077_s11 }
  0x4c   : > { %p2080_p12 = pnand %p2078_p9, %p2317_p13  ;;  %p2087_p4 = por %p2086_p2, %p2085_p1 }
  0x4e   : > { %p2081_p0 = pneg %p2080_p12 }
  0x50   : > { %p2088_p8 = pnand %p2087_p4, %p2081_p0 }
  0x52   : > { %2091 = shalt.err (!%p2088_p8)
}
  0x53   : > { %1925 = dma.hbm_to_vmem [thread:$0]  (!%p2301_p11), %s2707_s5, 1024, %s253_s16, [#allocation9], %s2201_s13, %s2201_s13, %s2202_s15  }
  0x54   : > { %s2390_s22 = sadd.s32 1, %s2196_s27   ;;  %s32_s17 = sadd.s32 1, %s2192_s26 }
  0x55   : > { %s29_s12 = ssub.s32 %s2196_s27, %s2390_s22  ;;  %p39_p8 = scmp.ne.s32.totalorder %s2192_s26, %s2188_s25 }
  0x56   : > { %p30_p4 = scmp.eq.s32.totalorder %s29_s12, 0  ;;  %p40_p13 = scmp.eq.s32.totalorder %s2196_s27, 0 }
  0x57   : > { %p1937_p6 = scmp.lt.s32.totalorder %s2196_s27, 2  ;;  %p2720_p3 = scmp.eq.s32.totalorder %s2271_s28, 1 }
  0x58   : > { %s2400_s18 = scalar_select %p30_p4, %s2192_s26, %s32_s17  }
  0x59   : > { %p41_p10 = por %p40_p13, %p39_p8  ;;  %p2404_p5 = por %p2720_p3, %p39_p8 }
  0x5a   : > { %s269_s20 = sand.u32 1, %s2192_s26   ;;  %s1539_s21 = sshll.u32 %s2196_s27, 12 }
  0x5b   : > { %s1468_s16 = sshll.u32 %s269_s20, 8  ;;  %s2413_s23 = scalar_lea.hbm %s2702_s0, %s1539_s21 }
  0x5c   : > { %s273_s29 = scalar_lea.vmem [#allocation2], %s1468_s16  ;;  %p2415_p11 = pnand %p1937_p6, %p41_p10 }
  0x5d   : > { %s280_s10 = sshll.u32 %s273_s29, 4  ;;  %s2421_s14 = scalar_lea.sflag [#allocation3], %s269_s20  ;;  %s2419_s10 = int_to_ptr.vmem [resolvable:$true] %s280_s10 }
  0x5e   : > { %s2092_s8 = scalar_lea.hbm %s2413_s23, 4096  ;;  %p2094_p9 = pneg %p2415_p11 }
  0x5f   : > { %p2093_p7 = scmp.ne.s32.totalorder %s2413_s23, %s2092_s8  ;;  %s2097_s21 = scalar_lea.hbm %s2702_s0, 8192 }
  0x60   : > { %p2098_p1 = scmp.lt.u32.totalorder %s2413_s23, %s2702_s0  ;;  %p2099_p2 = scmp.lt.u32.totalorder %s2097_s21, %s2092_s8 }
  0x61   : > { %p2095_p12 = pnand %p2094_p9, %p2093_p7  ;;  %p2101_p8 = scmp.lt.u32.totalorder %s2092_s8, %s2413_s23 }
  0x62   : > { %p2100_p4 = por %p2099_p2, %p2098_p1 }
  0x63   : > { %p2096_p0 = pneg %p2095_p12 }
  0x64   : > { %p2102_p13 = por %p2101_p8, %p2100_p4 }
  0x66   : > { %p2103_p6 = pnand %p2102_p13, %p2096_p0 }
  0x68   : > { %2106 = shalt.err (!%p2103_p6)
}
  0x69   : > { %s2107_s20 = scalar_lea.vmem %s2419_s10, 4096  ;;  %s2203_s15 = smov [#allocation2]  }
  0x6a   : > { %p2108_p10 = scmp.ne.s32.totalorder %s2419_s10, %s2107_s20  ;;  %s2112_s29 = sshll.u32 %s2203_s15, 4  ;;  %s2113_s29 = int_to_ptr.vmem [resolvable:$false] %s2112_s29 }
  0x6b   : > { %s2114_s12 = scalar_lea.vmem %s2113_s29, 8192  ;;  %p2115_p12 = scmp.lt.s32.totalorder %s2419_s10, %s2113_s29 }
  0x6c   : > { %p2110_p3 = pnand %p2108_p10, %p2094_p9  ;;  %p2116_p1 = scmp.lt.s32.totalorder %s2114_s12, %s2107_s20 }
  0x6e   : > { %p2111_p7 = pneg %p2110_p3  ;;  %p2117_p2 = por %p2116_p1, %p2115_p12 }
  0x70   : > { %p2118_p4 = pnand %p2117_p2, %p2111_p7 }
  0x72   : > { %2121 = shalt.err (!%p2118_p4)
}
  0x73   : > { %s2204_s8 = smov 128   ;;  %s2205_s17 = smov 8  }
  0x74   : > { %1929 = dma.hbm_to_vmem [thread:$0]  (!%p2415_p11), %s2413_s23, 4096, %s2419_s10, %s2421_s14, %s2204_s8, %s2204_s8, %s2205_s17  }
  0x75   : > { %p2723_p9 = scmp.ne.s32.totalorder %s2717_s9, 0 }
  0x76   : > { %s2452_s21 = sand.u32 (!%p2723_p9), 1, %s2188_s25   ;;  %p2724_p0 = scmp.ne.s32.totalorder (!%p2723_p9), %s2714_s30, 0 }
  0x77   : > { %292 = sbr.rel (%p2723_p9) target bundleno = 901 (0x385), region = 48  ;;  %s1472_s16 = sshll.u32 (!%p2723_p9), %s2452_s21, 8 }
  0x78   : > { %s295_s13 = scalar_lea.sflag (!%p2723_p9), [#allocation3], %s2452_s21  ;;  %s2456_s20 = scalar_lea.vmem (!%p2723_p9), [#allocation2], %s1472_s16 }
  0x7e   : > { %2167 = dma.done.wait (%p2724_p0), %s295_s13, 4096  }
  0x7f   : > { %2169 = vsyncadd (%p2724_p0), %s295_s13, 4294963200  ;;  %p2725_p11 = scmp.eq.s32.totalorder %s2271_s28, 0 }
  0x81   : > { %2171 = dma.done.wait (%p2725_p11), [#allocation6], 2048   ;;  %p2726_p8 = pmov %p2725_p11 }
  0x83   : > { %2173 = vsyncadd (%p2726_p8), [#allocation6], 4294965248  ;;  %p2727_p13 = pmov %p2726_p8 }
  0x84   : > { %p2728_p6 = pmov %p2726_p8 }
  0x85   : > { %2175 = dma.done.wait (%p2727_p13), [#allocation9], 1024  }
  0x86   : > { %2177 = vsyncadd (%p2728_p6), [#allocation9], 4294966272  ;;  %v1984_v0 = vld [vmem:[#allocation5] sm:$0xff]   ;;  %v1985_v1 = vld [vmem:[#allocation5 + $0x8] sm:$0xff]   ;;  %s1476_s15 = sshll.u32 %s2452_s21, 7  ;;  %s1572_s12 = sshll.u32 %s2271_s28, 11 }
  0x87   : > { %1740 = vmatprep.subr.bf16.mxu0 %v1984_v0  ;;  %1884 = vmatprep.subr.bf16.mxu1 %v1984_v0  ;;  %v1986_v2 = vld [vmem:[#allocation5 + $0x10] sm:$0xff]   ;;  %v1987_v3 = vld [vmem:[#allocation5 + $0x18] sm:$0xff]   ;;  %v344_v4 = vld [vmem:[%s2456_s20] sm:$0xff]  ;;  %s2605_s29 = scalar_lea.vmem [#allocation10], %s1476_s15  ;;  %s2654_s13 = scalar_lea.hbm %s2709_s7, %s1572_s12 }
  0x88   : > { %1741 = vmatpush3.bf16.msra.mxu0 %v1984_v0  ;;  %1892 = vmatpush3.bf16.msra.mxu1 %v1984_v0  ;;  %v345_v5 = vld [vmem:[%s2456_s20 + $0x8] sm:$0xff]  ;;  %v1988_v7 = vld [vmem:[#allocation5 + $0x20] sm:$0xff]   ;;  %v1990_v12 = vld [vmem:[#allocation5 + $0x30] sm:$0xff]   ;;  %s1360_s8 = sshll.u32 %s2605_s29, 4  ;;  %s1347_s28 = scalar_lea.sflag [#allocation4], %s2452_s21  ;;  %s2656_s8 = int_to_ptr.vmem [resolvable:$true] %s1360_s8 }
  0x89   : > { %1742 = vmatprep.subr.bf16.mxu0 %v1985_v1  ;;  %1885 = vmatprep.subr.bf16.mxu1 %v1985_v1  ;;  %v376_v6 = vpack.c.bf16 %v345_v5, %v344_v4  ;;  %v360_v8 = vld [vmem:[%s2456_s20 + $0x80] sm:$0xff]  ;;  %v361_v9 = vld [vmem:[%s2456_s20 + $0x88] sm:$0xff]  ;;  %v1991_v13 = vld [vmem:[#allocation5 + $0x38] sm:$0xff]   ;;  %s2207_s30 = smov [#allocation10]  }
  0x8a   : > { %v384_v10 = vpack.c.bf16 %v361_v9, %v360_v8  ;;  %v1989_v11 = vld [vmem:[#allocation5 + $0x28] sm:$0xff]   ;;  %v346_v14 = vld [vmem:[%s2456_s20 + $0x10] sm:$0xff]  ;;  %v347_v15 = vld [vmem:[%s2456_s20 + $0x18] sm:$0xff]  ;;  %s2126_s9 = sshll.u32 %s2207_s30, 4  ;;  %s2127_s9 = int_to_ptr.vmem [resolvable:$false] %s2126_s9 }
  0x8b   : > { %1756 = vmatprep.mubr.bf16.mxu0 %v376_v6  ;;  %v348_v16 = vld [vmem:[%s2456_s20 + $0x20] sm:$0xff]  ;;  %v349_v17 = vld [vmem:[%s2456_s20 + $0x28] sm:$0xff]  ;;  %v362_v18 = vld [vmem:[%s2456_s20 + $0x90] sm:$0xff]  ;;  %v377_v23 = vpack.c.bf16 %v347_v15, %v346_v14  ;;  %v637_v6 = vlaneseq  ;;  %s2128_s23 = scalar_lea.vmem %s2127_s9, 4096  ;;  %p2129_p12 = scmp.lt.s32.totalorder %s2656_s8, %s2127_s9 }
  0x8c   : > { %1743 = vmatpush3.bf16.msra.mxu0 %v1985_v1  ;;  %1893 = vmatpush3.bf16.msra.mxu1 %v1985_v1  ;;  %v363_v19 = vld [vmem:[%s2456_s20 + $0x98] sm:$0xff]  ;;  %v364_v20 = vld [vmem:[%s2456_s20 + $0xa0] sm:$0xff]  ;;  %v365_v21 = vld [vmem:[%s2456_s20 + $0xa8] sm:$0xff]  ;;  %v378_v24 = vpack.c.bf16 %v349_v17, %v348_v16 }
  0x8d   : > { %1744 = vmatprep.subr.bf16.mxu0 %v1986_v2  ;;  %1886 = vmatprep.subr.bf16.mxu1 %v1986_v2  ;;  %v1992_v22 = vld [vmem:[#allocation7] sm:$0xff]   ;;  %v385_v25 = vpack.c.bf16 %v363_v19, %v362_v18  ;;  %v386_v26 = vpack.c.bf16 %v365_v21, %v364_v20  ;;  %v1993_v27 = vld [vmem:[#allocation7 + $0x8] sm:$0xff]   ;;  %v350_v28 = vld [vmem:[%s2456_s20 + $0x30] sm:$0xff] }
  0x8e   : > { %1772 = vmatprep.mubr.bf16.mxu1 %v384_v10  ;;  %v351_v29 = vld [vmem:[%s2456_s20 + $0x38] sm:$0xff]  ;;  %v352_v30 = vld [vmem:[%s2456_s20 + $0x40] sm:$0xff]  ;;  %v353_v31 = vld [vmem:[%s2456_s20 + $0x48] sm:$0xff] }
  0x8f   : > { %v366_v32 = vld [vmem:[%s2456_s20 + $0xb0] sm:$0xff]  ;;  %v367_v33 = vld [vmem:[%s2456_s20 + $0xb8] sm:$0xff]  ;;  %v368_v34 = vld [vmem:[%s2456_s20 + $0xc0] sm:$0xff]  ;;  %v379_v37 = vpack.c.bf16 %v351_v29, %v350_v28  ;;  %v380_v38 = vpack.c.bf16 %v353_v31, %v352_v30 }
  0x90   : > { %1745 = vmatpush3.bf16.msra.mxu0 %v1986_v2  ;;  %1894 = vmatpush3.bf16.msra.mxu1 %v1986_v2  ;;  %v369_v35 = vld [vmem:[%s2456_s20 + $0xc8] sm:$0xff]  ;;  %v1994_v36 = vld [vmem:[#allocation7 + $0x10] sm:$0xff]   ;;  %v387_v39 = vpack.c.bf16 %v367_v33, %v366_v32  ;;  %v1995_v41 = vld [vmem:[#allocation7 + $0x18] sm:$0xff]  }
  0x91   : > { %1746 = vmatprep.subr.bf16.mxu0 %v1987_v3  ;;  %1887 = vmatprep.subr.bf16.mxu1 %v1987_v3  ;;  %v388_v40 = vpack.c.bf16 %v369_v35, %v368_v34  ;;  %v354_v42 = vld [vmem:[%s2456_s20 + $0x50] sm:$0xff]  ;;  %v355_v43 = vld [vmem:[%s2456_s20 + $0x58] sm:$0xff]  ;;  %v356_v44 = vld [vmem:[%s2456_s20 + $0x60] sm:$0xff] }
  0x92   : > { %v357_v45 = vld [vmem:[%s2456_s20 + $0x68] sm:$0xff]  ;;  %v370_v46 = vld [vmem:[%s2456_s20 + $0xd0] sm:$0xff]  ;;  %v371_v47 = vld [vmem:[%s2456_s20 + $0xd8] sm:$0xff]  ;;  %v381_v51 = vpack.c.bf16 %v355_v43, %v354_v42 }
  0x93   : > { %v372_v48 = vld [vmem:[%s2456_s20 + $0xe0] sm:$0xff]  ;;  %v373_v49 = vld [vmem:[%s2456_s20 + $0xe8] sm:$0xff]  ;;  %v382_v52 = vpack.c.bf16 %v357_v45, %v356_v44  ;;  %v389_v53 = vpack.c.bf16 %v371_v47, %v370_v46  ;;  %v358_v56 = vld [vmem:[%s2456_s20 + $0x70] sm:$0xff] }
  0x94   : > { %1747 = vmatpush3.bf16.msra.mxu0 %v1987_v3  ;;  %1895 = vmatpush3.bf16.msra.mxu1 %v1987_v3  ;;  %v1996_v50 = vld [vmem:[#allocation7 + $0x20] sm:$0xff]   ;;  %v390_v54 = vpack.c.bf16 %v373_v49, %v372_v48  ;;  %v1997_v55 = vld [vmem:[#allocation7 + $0x28] sm:$0xff]   ;;  %v359_v57 = vld [vmem:[%s2456_s20 + $0x78] sm:$0xff] }
  0x95   : > { %1748 = vmatprep.subr.bf16.mxu0 %v1988_v7  ;;  %1888 = vmatprep.subr.bf16.mxu1 %v1988_v7  ;;  %v374_v58 = vld [vmem:[%s2456_s20 + $0xf0] sm:$0xff]  ;;  %v375_v59 = vld [vmem:[%s2456_s20 + $0xf8] sm:$0xff]  ;;  %v383_v60 = vpack.c.bf16 %v359_v57, %v358_v56  ;;  %v2000_v0 = vld [vmem:[#allocation8] sm:$0xff]   ;;  %s2122_s20 = scalar_lea.vmem %s2656_s8, 2048 }
  0x96   : > { %v391_v61 = vpack.c.bf16 %v375_v59, %v374_v58  ;;  %v1998_v62 = vld [vmem:[#allocation7 + $0x30] sm:$0xff]   ;;  %v1999_v63 = vld [vmem:[#allocation7 + $0x38] sm:$0xff]   ;;  %v2001_v1 = vld [vmem:[#allocation8 + $0x8] sm:$0xff]   ;;  %p2123_p10 = scmp.ne.s32.totalorder %s2656_s8, %s2122_s20  ;;  %p2130_p1 = scmp.lt.s32.totalorder %s2128_s23, %s2122_s20 }
  0x97   : > { %v2002_v2 = vld [vmem:[#allocation8 + $0x10] sm:$0xff]   ;;  %v2003_v3 = vld [vmem:[#allocation8 + $0x18] sm:$0xff]   ;;  %v2004_v4 = vld [vmem:[#allocation8 + $0x20] sm:$0xff]  }
  0x98   : > { %1749 = vmatpush3.bf16.msra.mxu0 %v1988_v7  ;;  %1896 = vmatpush3.bf16.msra.mxu1 %v1988_v7  ;;  %v2005_v5 = vld [vmem:[#allocation8 + $0x28] sm:$0xff]   ;;  %v2502_v7 = vshrl.u32 %v637_v6, 7  ;;  %v633_v8 = vld [vmem:[%s2704_s2] sm:$0x1]  ;;  %p2124_p3 = pnand %p2123_p10, %p2404_p5  ;;  %p2131_p2 = por %p2130_p1, %p2129_p12 }
  0x99   : > { %1750 = vmatprep.subr.bf16.mxu0 %v1989_v11  ;;  %1889 = vmatprep.subr.bf16.mxu1 %v1989_v11  ;;  %v635_v9 = vpack.i.b16 %v633_v8, %v633_v8 }
  0x9a   : > { %v639_v10 = vsub.s32 0, %v2502_v7  ;;  %p2125_p7 = pneg %p2124_p3 }
  0x9c   : > { %1751 = vmatpush3.bf16.msra.mxu0 %v1989_v11  ;;  %1897 = vmatpush3.bf16.msra.mxu1 %v1989_v11  ;;  %p2132_p4 = pnand %p2131_p2, %p2125_p7 }
  0x9d   : > { %1752 = vmatprep.subr.bf16.mxu0 %v1990_v12  ;;  %1890 = vmatprep.subr.bf16.mxu1 %v1990_v12 }
  0xa0   : > { %1753 = vmatpush3.bf16.msra.mxu0 %v1990_v12  ;;  %1898 = vmatpush3.bf16.msra.mxu1 %v1990_v12 }
  0xa1   : > { %1754 = vmatprep.subr.bf16.mxu0 %v1991_v13  ;;  %1891 = vmatprep.subr.bf16.mxu1 %v1991_v13 }
  0xa4   : > { %1755 = vmatpush3.bf16.msra.mxu0 %v1991_v13  ;;  %1899 = vmatpush3.bf16.msra.mxu1 %v1991_v13  ;;  %v2510_v13 = vrot.slane %v635_v9, %v639_v10 }
  0xa5   : > { %1788 = vmatprep.subr.bf16.mxu1 %v1992_v22  ;;  %1836 = vmatprep.subr.bf16.mxu0 %v2000_v0 }
  0xa7   : > { %1757 = vmatmul.mubr.bf16.vlgmr.msra.gmra.mrb[0].mxu0 %v377_v23  ;;  %1773 = vmatmul.mubr.bf16.vlgmr.msra.gmra.mrb[0].mxu1 %v385_v25 }
  0xa8   : > { %1760 = vmatprep.mubr.bf16.mxu0 %v378_v24  ;;  %1776 = vmatprep.mubr.bf16.mxu1 %v386_v26 }
  0xa9   : > { %1789 = vmatpush3.bf16.msra.mxu1 %v1992_v22  ;;  %1837 = vmatpush3.bf16.msra.mxu0 %v2000_v0 }
  0xaa   : > { %1790 = vmatprep.subr.bf16.mxu1 %v1993_v27  ;;  %1838 = vmatprep.subr.bf16.mxu0 %v2001_v1 }
  0xad   : > { %1791 = vmatpush3.bf16.msra.mxu1 %v1993_v27  ;;  %1839 = vmatpush3.bf16.msra.mxu0 %v2001_v1  ;;  %v2206_v27 = vmov 0  }
  0xae   : > { %1792 = vmatprep.subr.bf16.mxu1 %v1994_v36  ;;  %1840 = vmatprep.subr.bf16.mxu0 %v2002_v2 }
  0xaf   : > { %1761 = vmatmul.mubr.bf16.gmra.mrb[4].mxu0 %v379_v37  ;;  %1777 = vmatmul.mubr.bf16.gmra.mrb[4].mxu1 %v387_v39 }
  0xb0   : > { %1764 = vmatprep.mubr.bf16.mxu0 %v380_v38  ;;  %1780 = vmatprep.mubr.bf16.mxu1 %v388_v40 }
  0xb1   : > { %1793 = vmatpush3.bf16.msra.mxu1 %v1994_v36  ;;  %1841 = vmatpush3.bf16.msra.mxu0 %v2002_v2 }
  0xb2   : > { %1794 = vmatprep.subr.bf16.mxu1 %v1995_v41  ;;  %1842 = vmatprep.subr.bf16.mxu0 %v2003_v3 }
  0xb5   : > { %1795 = vmatpush3.bf16.msra.mxu1 %v1995_v41  ;;  %1843 = vmatpush3.bf16.msra.mxu0 %v2003_v3 }
  0xb6   : > { %1796 = vmatprep.subr.bf16.mxu1 %v1996_v50  ;;  %1844 = vmatprep.subr.bf16.mxu0 %v2004_v4 }
  0xb7   : > { %1765 = vmatmul.mubr.bf16.gmra.mrb[8].mxu0 %v381_v51  ;;  %1781 = vmatmul.mubr.bf16.gmra.mrb[8].mxu1 %v389_v53 }
  0xb8   : > { %1768 = vmatprep.mubr.bf16.mxu0 %v382_v52  ;;  %1784 = vmatprep.mubr.bf16.mxu1 %v390_v54 }
  0xb9   : > { %1797 = vmatpush3.bf16.msra.mxu1 %v1996_v50  ;;  %1845 = vmatpush3.bf16.msra.mxu0 %v2004_v4 }
  0xba   : > { %1798 = vmatprep.subr.bf16.mxu1 %v1997_v55  ;;  %1846 = vmatprep.subr.bf16.mxu0 %v2005_v5 }
  0xbd   : > { %1799 = vmatpush3.bf16.msra.mxu1 %v1997_v55  ;;  %1847 = vmatpush3.bf16.msra.mxu0 %v2005_v5 }
  0xbe   : > { %1800 = vmatprep.subr.bf16.mxu1 %v1998_v62 }
  0xbf   : > { %1769 = vmatmul.mubr.bf16.gmra.mrb[12].mxu0 %v383_v60  ;;  %1785 = vmatmul.mubr.bf16.gmra.mrb[12].mxu1 %v391_v61 }
  0xc1   : > { %1801 = vmatpush3.bf16.msra.mxu1 %v1998_v62 }
  0xc2   : > { %1802 = vmatprep.subr.bf16.mxu1 %v1999_v63 }
  0xc5   : > { %1803 = vmatpush3.bf16.msra.mxu1 %v1999_v63 }
 0x17a   : > { %v1758_v11 = vpop.f32.mrb[0].mxu0  ;;  %v2512_v14 = vpop.f32.mrb[0].mxu1 }
 0x17b   : > { %v490_v12 = vpop.f32.mrb[1].mxu0  ;;  %v554_v16 = vpop.f32.mrb[1].mxu1 }
 0x17c   : > { %v1759_v15 = vpop.f32.mrb[2].mxu0  ;;  %v2514_v19 = vpop.f32.mrb[2].mxu1 }
 0x17d   : > { %v618_v17 = vpack.c.bf16 %v1759_v15, %v1758_v11  ;;  %v493_v18 = vpop.f32.mrb[3].mxu0  ;;  %v626_v21 = vpack.c.bf16 %v2514_v19, %v2512_v14  ;;  %v557_v22 = vpop.f32.mrb[3].mxu1 }
 0x17e   : > { %v617_v20 = vpack.c.bf16 %v493_v18, %v490_v12  ;;  %v625_v24 = vpack.c.bf16 %v557_v22, %v554_v16 }
 0x17f   : > { %v642_v23 = vadd.bf16 %v2510_v13, %v618_v17  ;;  %v650_v22 = vadd.bf16 %v2510_v13, %v626_v21 }
 0x180   : > { %v641_v25 = vadd.bf16 %v2510_v13, %v617_v20  ;;  %v649_v6 = vadd.bf16 %v2510_v13, %v625_v24 }
 0x181   : > { %v658_v29 = vmax.bf16 %v2206_v27, %v642_v23  ;;  %v666_v24 = vmax.bf16 %v2206_v27, %v650_v22 }
 0x182   : > { %v1762_v26 = vpop.f32.mrb[4].mxu0  ;;  %v657_v28 = vmax.bf16 %v2206_v27, %v641_v25  ;;  %v2522_v31 = vpop.f32.mrb[4].mxu1  ;;  %v665_v17 = vmax.bf16 %v2206_v27, %v649_v6 }
 0x183   : > { %v506_v30 = vpop.f32.mrb[5].mxu0  ;;  %v570_v33 = vpop.f32.mrb[5].mxu1 }
 0x184   : > { %v1763_v32 = vpop.f32.mrb[6].mxu0  ;;  %1804 = vmatprep.mubr.bf16.mxu1 %v657_v28  ;;  %v1779_v36 = vpop.f32.mrb[6].mxu1 }
 0x185   : > { %v620_v34 = vpack.c.bf16 %v1763_v32, %v1762_v26  ;;  %v509_v35 = vpop.f32.mrb[7].mxu0  ;;  %1805 = vmatmul.mubr.bf16.vlgmr.msra.gmra.mrb[16].mxu1 %v658_v29  ;;  %v628_v38 = vpack.c.bf16 %v1779_v36, %v2522_v31  ;;  %v573_v39 = vpop.f32.mrb[7].mxu1 }
 0x186   : > { %v619_v37 = vpack.c.bf16 %v509_v35, %v506_v30  ;;  %v627_v41 = vpack.c.bf16 %v573_v39, %v570_v33  ;;  %v2006_v33 = vld [vmem:[#allocation8 + $0x30] sm:$0xff]   ;;  %v914_v35 = vld [vmem:[%s2706_s4] sm:$0x1] }
 0x187   : > { %v644_v40 = vadd.bf16 %v2510_v13, %v620_v34  ;;  %v652_v26 = vadd.bf16 %v2510_v13, %v628_v38  ;;  %1848 = vmatprep.subr.bf16.mxu0 %v2006_v33  ;;  %v2007_v34 = vld [vmem:[#allocation8 + $0x38] sm:$0xff]   ;;  %v916_v36 = vpack.i.b16 %v914_v35, %v914_v35 }
 0x188   : > { %v643_v42 = vadd.bf16 %v2510_v13, %v619_v37  ;;  %v651_v20 = vadd.bf16 %v2510_v13, %v627_v41  ;;  %1849 = vmatpush3.bf16.msra.mxu0 %v2006_v33 }
 0x189   : > { %v660_v46 = vmax.bf16 %v2206_v27, %v644_v40  ;;  %v668_v29 = vmax.bf16 %v2206_v27, %v652_v26  ;;  %1850 = vmatprep.subr.bf16.mxu0 %v2007_v34  ;;  %v2561_v39 = vrot.slane %v916_v36, %v639_v10 }
 0x18a   : > { %v1766_v43 = vpop.f32.mrb[8].mxu0  ;;  %v659_v44 = vmax.bf16 %v2206_v27, %v643_v42  ;;  %v1782_v47 = vpop.f32.mrb[8].mxu1  ;;  %v667_v23 = vmax.bf16 %v2206_v27, %v651_v20 }
 0x18b   : > { %v522_v45 = vpop.f32.mrb[9].mxu0  ;;  %v586_v49 = vpop.f32.mrb[9].mxu1 }
 0x18c   : > { %v1767_v48 = vpop.f32.mrb[10].mxu0  ;;  %1808 = vmatprep.mubr.bf16.mxu1 %v659_v44  ;;  %v1783_v52 = vpop.f32.mrb[10].mxu1  ;;  %1851 = vmatpush3.bf16.msra.mxu0 %v2007_v34 }
 0x18d   : > { %v622_v50 = vpack.c.bf16 %v1767_v48, %v1766_v43  ;;  %v525_v51 = vpop.f32.mrb[11].mxu0  ;;  %1809 = vmatmul.mubr.bf16.gmra.mrb[20].mxu1 %v660_v46  ;;  %v630_v54 = vpack.c.bf16 %v1783_v52, %v1782_v47  ;;  %v589_v55 = vpop.f32.mrb[11].mxu1 }
 0x18e   : > { %v621_v53 = vpack.c.bf16 %v525_v51, %v522_v45  ;;  %v629_v57 = vpack.c.bf16 %v589_v55, %v586_v49 }
 0x18f   : > { %v646_v56 = vadd.bf16 %v2510_v13, %v622_v50  ;;  %v654_v19 = vadd.bf16 %v2510_v13, %v630_v54 }
 0x190   : > { %v645_v58 = vadd.bf16 %v2510_v13, %v621_v53  ;;  %v653_v25 = vadd.bf16 %v2510_v13, %v629_v57 }
 0x191   : > { %v662_v62 = vmax.bf16 %v2206_v27, %v646_v56  ;;  %v670_v30 = vmax.bf16 %v2206_v27, %v654_v19 }
 0x192   : > { %v1770_v59 = vpop.f32.mrb[12].mxu0  ;;  %v661_v60 = vmax.bf16 %v2206_v27, %v645_v58  ;;  %v1786_v63 = vpop.f32.mrb[12].mxu1  ;;  %v669_v28 = vmax.bf16 %v2206_v27, %v653_v25 }
 0x193   : > { %v538_v61 = vpop.f32.mrb[13].mxu0  ;;  %v602_v1 = vpop.f32.mrb[13].mxu1 }
 0x194   : > { %v1771_v0 = vpop.f32.mrb[14].mxu0  ;;  %1812 = vmatprep.mubr.bf16.mxu1 %v661_v60  ;;  %v1787_v4 = vpop.f32.mrb[14].mxu1 }
 0x195   : > { %v624_v2 = vpack.c.bf16 %v1771_v0, %v1770_v59  ;;  %v541_v3 = vpop.f32.mrb[15].mxu0  ;;  %1813 = vmatmul.mubr.bf16.gmra.mrb[24].mxu1 %v662_v62  ;;  %v632_v8 = vpack.c.bf16 %v1787_v4, %v1786_v63  ;;  %v605_v9 = vpop.f32.mrb[15].mxu1 }
 0x196   : > { %v623_v5 = vpack.c.bf16 %v541_v3, %v538_v61  ;;  %v631_v12 = vpack.c.bf16 %v605_v9, %v602_v1 }
 0x197   : > { %v648_v11 = vadd.bf16 %v2510_v13, %v624_v2  ;;  %v656_v31 = vadd.bf16 %v2510_v13, %v632_v8 }
 0x198   : > { %v647_v15 = vadd.bf16 %v2510_v13, %v623_v5  ;;  %v655_v14 = vadd.bf16 %v2510_v13, %v631_v12 }
 0x199   : > { %v664_v18 = vmax.bf16 %v2206_v27, %v648_v11  ;;  %v672_v32 = vmax.bf16 %v2206_v27, %v656_v31 }
 0x19a   : > { %v663_v16 = vmax.bf16 %v2206_v27, %v647_v15  ;;  %v671_v21 = vmax.bf16 %v2206_v27, %v655_v14 }
 0x19c   : > { %1816 = vmatprep.mubr.bf16.mxu1 %v663_v16 }
 0x19d   : > { %1817 = vmatmul.mubr.bf16.gmra.mrb[28].mxu1 %v664_v18 }
 0x19e   : > { %1820 = vmatprep.mubr.bf16.mxu1 %v665_v17 }
 0x1a5   : > { %1821 = vmatmul.mubr.bf16.gmra.mrb[32].mxu1 %v666_v24 }
 0x1a6   : > { %1824 = vmatprep.mubr.bf16.mxu1 %v667_v23 }
 0x1ad   : > { %1825 = vmatmul.mubr.bf16.gmra.mrb[36].mxu1 %v668_v29 }
 0x1ae   : > { %1828 = vmatprep.mubr.bf16.mxu1 %v669_v28 }
 0x1b5   : > { %1829 = vmatmul.mubr.bf16.gmra.mrb[40].mxu1 %v670_v30 }
 0x1b6   : > { %1832 = vmatprep.mubr.bf16.mxu1 %v671_v21 }
 0x1bd   : > { %1833 = vmatmul.mubr.bf16.gmra.mrb[44].mxu1 %v672_v32 }
 0x258   : > { %v1806_v37 = vpop.f32.mrb[16].mxu1 }
 0x259   : > { %v771_v38 = vpop.f32.mrb[17].mxu1 }
 0x25a   : > { %v1807_v13 = vpop.f32.mrb[18].mxu1 }
 0x25b   : > { %v899_v40 = vpack.c.bf16 %v1807_v13, %v1806_v37  ;;  %v774_v41 = vpop.f32.mrb[19].mxu1 }
 0x25c   : > { %v898_v42 = vpack.c.bf16 %v774_v41, %v771_v38 }
 0x25d   : > { %v923_v43 = vadd.bf16 %v2561_v39, %v899_v40 }
 0x25e   : > { %v922_v44 = vadd.bf16 %v2561_v39, %v898_v42 }
 0x25f   : > { %v939_v47 = vmax.bf16 %v2206_v27, %v923_v43 }
 0x260   : > { %v1810_v45 = vpop.f32.mrb[20].mxu1  ;;  %v938_v46 = vmax.bf16 %v2206_v27, %v922_v44 }
 0x261   : > { %v787_v48 = vpop.f32.mrb[21].mxu1 }
 0x262   : > { %v1811_v49 = vpop.f32.mrb[22].mxu1  ;;  %1852 = vmatprep.mubr.bf16.mxu0 %v938_v46 }
 0x263   : > { %v901_v50 = vpack.c.bf16 %v1811_v49, %v1810_v45  ;;  %v790_v7 = vpop.f32.mrb[23].mxu1  ;;  %1853 = vmatmul.mubr.bf16.vlgmr.msra.gmra.mrb[16].mxu0 %v939_v47 }
 0x264   : > { %v900_v10 = vpack.c.bf16 %v790_v7, %v787_v48 }
 0x265   : > { %v925_v51 = vadd.bf16 %v2561_v39, %v901_v50 }
 0x266   : > { %v924_v52 = vadd.bf16 %v2561_v39, %v900_v10 }
 0x267   : > { %v941_v56 = vmax.bf16 %v2206_v27, %v925_v51 }
 0x268   : > { %v1814_v53 = vpop.f32.mrb[24].mxu1  ;;  %v940_v54 = vmax.bf16 %v2206_v27, %v924_v52 }
 0x269   : > { %v803_v55 = vpop.f32.mrb[25].mxu1 }
 0x26a   : > { %v1815_v57 = vpop.f32.mrb[26].mxu1  ;;  %1856 = vmatprep.mubr.bf16.mxu0 %v940_v54  ;;  %v2598_v54 = vld [vmem:[%s2708_s6] ss:$0 sm:$0xff] }
 0x26b   : > { %v903_v58 = vpack.c.bf16 %v1815_v57, %v1814_v53  ;;  %v806_v59 = vpop.f32.mrb[27].mxu1  ;;  %1857 = vmatmul.mubr.bf16.gmra.mrb[20].mxu0 %v941_v56 }
 0x26c   : > { %v902_v60 = vpack.c.bf16 %v806_v59, %v803_v55 }
 0x26d   : > { %v927_v61 = vadd.bf16 %v2561_v39, %v903_v58 }
 0x26e   : > { %v926_v62 = vadd.bf16 %v2561_v39, %v902_v60 }
 0x26f   : > { %v943_v2 = vmax.bf16 %v2206_v27, %v927_v61 }
 0x270   : > { %v1818_v63 = vpop.f32.mrb[28].mxu1  ;;  %v942_v0 = vmax.bf16 %v2206_v27, %v926_v62 }
 0x271   : > { %v819_v1 = vpop.f32.mrb[29].mxu1 }
 0x272   : > { %v1819_v3 = vpop.f32.mrb[30].mxu1  ;;  %1860 = vmatprep.mubr.bf16.mxu0 %v942_v0 }
 0x273   : > { %v905_v4 = vpack.c.bf16 %v1819_v3, %v1818_v63  ;;  %v822_v5 = vpop.f32.mrb[31].mxu1  ;;  %1861 = vmatmul.mubr.bf16.gmra.mrb[24].mxu0 %v943_v2 }
 0x274   : > { %v904_v6 = vpack.c.bf16 %v822_v5, %v819_v1 }
 0x275   : > { %v929_v8 = vadd.bf16 %v2561_v39, %v905_v4 }
 0x276   : > { %v928_v9 = vadd.bf16 %v2561_v39, %v904_v6 }
 0x277   : > { %v945_v16 = vmax.bf16 %v2206_v27, %v929_v8 }
 0x278   : > { %v1822_v11 = vpop.f32.mrb[32].mxu1  ;;  %v944_v12 = vmax.bf16 %v2206_v27, %v928_v9 }
 0x279   : > { %v835_v15 = vpop.f32.mrb[33].mxu1 }
 0x27a   : > { %v1823_v17 = vpop.f32.mrb[34].mxu1  ;;  %1864 = vmatprep.mubr.bf16.mxu0 %v944_v12 }
 0x27b   : > { %v907_v18 = vpack.c.bf16 %v1823_v17, %v1822_v11  ;;  %v838_v20 = vpop.f32.mrb[35].mxu1  ;;  %1865 = vmatmul.mubr.bf16.gmra.mrb[28].mxu0 %v945_v16 }
 0x27c   : > { %v906_v22 = vpack.c.bf16 %v838_v20, %v835_v15 }
 0x27d   : > { %v931_v23 = vadd.bf16 %v2561_v39, %v907_v18 }
 0x27e   : > { %v930_v24 = vadd.bf16 %v2561_v39, %v906_v22 }
 0x27f   : > { %v947_v29 = vmax.bf16 %v2206_v27, %v931_v23 }
 0x280   : > { %v1826_v25 = vpop.f32.mrb[36].mxu1  ;;  %v946_v26 = vmax.bf16 %v2206_v27, %v930_v24 }
 0x281   : > { %v851_v28 = vpop.f32.mrb[37].mxu1 }
 0x282   : > { %v1827_v14 = vpop.f32.mrb[38].mxu1  ;;  %1868 = vmatprep.mubr.bf16.mxu0 %v946_v26 }
 0x283   : > { %v909_v19 = vpack.c.bf16 %v1827_v14, %v1826_v25  ;;  %v854_v21 = vpop.f32.mrb[39].mxu1  ;;  %1869 = vmatmul.mubr.bf16.gmra.mrb[32].mxu0 %v947_v29 }
 0x284   : > { %v908_v30 = vpack.c.bf16 %v854_v21, %v851_v28 }
 0x285   : > { %v933_v31 = vadd.bf16 %v2561_v39, %v909_v19 }
 0x286   : > { %v932_v32 = vadd.bf16 %v2561_v39, %v908_v30 }
 0x287   : > { %v949_v36 = vmax.bf16 %v2206_v27, %v933_v31 }
 0x288   : > { %v1830_v33 = vpop.f32.mrb[40].mxu1  ;;  %v948_v34 = vmax.bf16 %v2206_v27, %v932_v32 }
 0x289   : > { %v867_v35 = vpop.f32.mrb[41].mxu1 }
 0x28a   : > { %v1831_v37 = vpop.f32.mrb[42].mxu1  ;;  %1872 = vmatprep.mubr.bf16.mxu0 %v948_v34 }
 0x28b   : > { %v911_v38 = vpack.c.bf16 %v1831_v37, %v1830_v33  ;;  %v870_v13 = vpop.f32.mrb[43].mxu1  ;;  %1873 = vmatmul.mubr.bf16.gmra.mrb[36].mxu0 %v949_v36 }
 0x28c   : > { %v910_v40 = vpack.c.bf16 %v870_v13, %v867_v35 }
 0x28d   : > { %v935_v41 = vadd.bf16 %v2561_v39, %v911_v38 }
 0x28e   : > { %v934_v42 = vadd.bf16 %v2561_v39, %v910_v40 }
 0x28f   : > { %v951_v46 = vmax.bf16 %v2206_v27, %v935_v41 }
 0x290   : > { %v1834_v43 = vpop.f32.mrb[44].mxu1  ;;  %v950_v44 = vmax.bf16 %v2206_v27, %v934_v42 }
 0x291   : > { %v883_v45 = vpop.f32.mrb[45].mxu1 }
 0x292   : > { %v1835_v47 = vpop.f32.mrb[46].mxu1  ;;  %1876 = vmatprep.mubr.bf16.mxu0 %v950_v44 }
 0x293   : > { %v913_v48 = vpack.c.bf16 %v1835_v47, %v1834_v43  ;;  %v886_v49 = vpop.f32.mrb[47].mxu1  ;;  %1877 = vmatmul.mubr.bf16.gmra.mrb[40].mxu0 %v951_v46 }
 0x294   : > { %v912_v50 = vpack.c.bf16 %v886_v49, %v883_v45 }
 0x295   : > { %v937_v7 = vadd.bf16 %v2561_v39, %v913_v48 }
 0x296   : > { %v936_v10 = vadd.bf16 %v2561_v39, %v912_v50 }
 0x297   : > { %v953_v52 = vmax.bf16 %v2206_v27, %v937_v7 }
 0x298   : > { %v952_v51 = vmax.bf16 %v2206_v27, %v936_v10 }
 0x29a   : > { %1880 = vmatprep.mubr.bf16.mxu0 %v952_v51 }
 0x29b   : > { %1881 = vmatmul.mubr.bf16.gmra.mrb[44].mxu0 %v953_v52 }
 0x336   : > { %v1854_v53 = vpop.f32.mrb[16].mxu0 }
 0x337   : > { %v1059_v55 = vpop.f32.mrb[17].mxu0  ;;  %v1068_v57 = vadd.f32 %v1854_v53, %v2598_v54 }
 0x338   : > { %v1855_v56 = vpop.f32.mrb[18].mxu0  ;;  %v1060_v59 = vadd.f32 %v2598_v54, %v1059_v55 }
 0x339   : > { %v1071_v58 = vadd.f32 %v1855_v56, %v2598_v54  ;;  %v1062_v39 = vpop.f32.mrb[19].mxu0 }
 0x33a   : > { %v1063_v27 = vadd.f32 %v2598_v54, %v1062_v39 }
 0x33b   : > { %v1581_v60 = vpack.c.bf16 %v1071_v58, %v1068_v57 }
 0x33c   : > { %v1576_v61 = vpack.c.bf16 %v1063_v27, %v1060_v59 }
 0x33d   : > { %1653 = vst [vmem:[%s2605_s29 + $0x8] sm:$0xff] %v1581_v60  }
 0x33e   : > { %1577 = vst [vmem:[%s2605_s29] sm:$0xff] %v1576_v61   ;;  %v1858_v62 = vpop.f32.mrb[20].mxu0 }
 0x33f   : > { %v1075_v63 = vpop.f32.mrb[21].mxu0  ;;  %v1084_v1 = vadd.f32 %v1858_v62, %v2598_v54 }
 0x340   : > { %v1859_v0 = vpop.f32.mrb[22].mxu0  ;;  %v1076_v4 = vadd.f32 %v2598_v54, %v1075_v63 }
 0x341   : > { %v1087_v2 = vadd.f32 %v1859_v0, %v2598_v54  ;;  %v1078_v3 = vpop.f32.mrb[23].mxu0 }
 0x342   : > { %v1079_v5 = vadd.f32 %v2598_v54, %v1078_v3 }
 0x343   : > { %v1591_v6 = vpack.c.bf16 %v1087_v2, %v1084_v1 }
 0x344   : > { %v1586_v8 = vpack.c.bf16 %v1079_v5, %v1076_v4 }
 0x345   : > { %1655 = vst [vmem:[%s2605_s29 + $0x18] sm:$0xff] %v1591_v6  }
 0x346   : > { %1654 = vst [vmem:[%s2605_s29 + $0x10] sm:$0xff] %v1586_v8   ;;  %v1862_v9 = vpop.f32.mrb[24].mxu0 }
 0x347   : > { %v1091_v11 = vpop.f32.mrb[25].mxu0  ;;  %v1100_v15 = vadd.f32 %v1862_v9, %v2598_v54 }
 0x348   : > { %v1863_v12 = vpop.f32.mrb[26].mxu0  ;;  %v1092_v18 = vadd.f32 %v2598_v54, %v1091_v11 }
 0x349   : > { %v1103_v16 = vadd.f32 %v1863_v12, %v2598_v54  ;;  %v1094_v17 = vpop.f32.mrb[27].mxu0 }
 0x34a   : > { %v1095_v20 = vadd.f32 %v2598_v54, %v1094_v17 }
 0x34b   : > { %v1601_v22 = vpack.c.bf16 %v1103_v16, %v1100_v15 }
 0x34c   : > { %v1596_v23 = vpack.c.bf16 %v1095_v20, %v1092_v18 }
 0x34d   : > { %1657 = vst [vmem:[%s2605_s29 + $0x28] sm:$0xff] %v1601_v22  }
 0x34e   : > { %1656 = vst [vmem:[%s2605_s29 + $0x20] sm:$0xff] %v1596_v23   ;;  %v1866_v24 = vpop.f32.mrb[28].mxu0 }
 0x34f   : > { %v1107_v25 = vpop.f32.mrb[29].mxu0  ;;  %v1116_v28 = vadd.f32 %v1866_v24, %v2598_v54 }
 0x350   : > { %v1867_v26 = vpop.f32.mrb[30].mxu0  ;;  %v1108_v19 = vadd.f32 %v2598_v54, %v1107_v25 }
 0x351   : > { %v1119_v29 = vadd.f32 %v1867_v26, %v2598_v54  ;;  %v1110_v14 = vpop.f32.mrb[31].mxu0 }
 0x352   : > { %v1111_v21 = vadd.f32 %v2598_v54, %v1110_v14 }
 0x353   : > { %v1611_v30 = vpack.c.bf16 %v1119_v29, %v1116_v28 }
 0x354   : > { %v1606_v31 = vpack.c.bf16 %v1111_v21, %v1108_v19 }
 0x355   : > { %1659 = vst [vmem:[%s2605_s29 + $0x38] sm:$0xff] %v1611_v30  }
 0x356   : > { %1658 = vst [vmem:[%s2605_s29 + $0x30] sm:$0xff] %v1606_v31   ;;  %v1870_v32 = vpop.f32.mrb[32].mxu0 }
 0x357   : > { %v1123_v33 = vpop.f32.mrb[33].mxu0  ;;  %v1132_v35 = vadd.f32 %v1870_v32, %v2598_v54 }
 0x358   : > { %v1871_v34 = vpop.f32.mrb[34].mxu0  ;;  %v1124_v38 = vadd.f32 %v2598_v54, %v1123_v33 }
 0x359   : > { %v1135_v36 = vadd.f32 %v1871_v34, %v2598_v54  ;;  %v1126_v37 = vpop.f32.mrb[35].mxu0 }
 0x35a   : > { %v1127_v13 = vadd.f32 %v2598_v54, %v1126_v37 }
 0x35b   : > { %v1621_v40 = vpack.c.bf16 %v1135_v36, %v1132_v35 }
 0x35c   : > { %v1616_v41 = vpack.c.bf16 %v1127_v13, %v1124_v38 }
 0x35d   : > { %1661 = vst [vmem:[%s2605_s29 + $0x48] sm:$0xff] %v1621_v40  }
 0x35e   : > { %1660 = vst [vmem:[%s2605_s29 + $0x40] sm:$0xff] %v1616_v41   ;;  %v1874_v42 = vpop.f32.mrb[36].mxu0 }
 0x35f   : > { %v1139_v43 = vpop.f32.mrb[37].mxu0  ;;  %v1148_v45 = vadd.f32 %v1874_v42, %v2598_v54 }
 0x360   : > { %v1875_v44 = vpop.f32.mrb[38].mxu0  ;;  %v1140_v48 = vadd.f32 %v2598_v54, %v1139_v43 }
 0x361   : > { %v1151_v46 = vadd.f32 %v1875_v44, %v2598_v54  ;;  %v1142_v47 = vpop.f32.mrb[39].mxu0 }
 0x362   : > { %v1143_v49 = vadd.f32 %v2598_v54, %v1142_v47 }
 0x363   : > { %v1631_v50 = vpack.c.bf16 %v1151_v46, %v1148_v45 }
 0x364   : > { %v1626_v7 = vpack.c.bf16 %v1143_v49, %v1140_v48 }
 0x365   : > { %1663 = vst [vmem:[%s2605_s29 + $0x58] sm:$0xff] %v1631_v50  }
 0x366   : > { %1662 = vst [vmem:[%s2605_s29 + $0x50] sm:$0xff] %v1626_v7   ;;  %v1878_v10 = vpop.f32.mrb[40].mxu0 }
 0x367   : > { %v1155_v51 = vpop.f32.mrb[41].mxu0  ;;  %v1164_v53 = vadd.f32 %v1878_v10, %v2598_v54 }
 0x368   : > { %v1879_v52 = vpop.f32.mrb[42].mxu0  ;;  %v1156_v57 = vadd.f32 %v2598_v54, %v1155_v51 }
 0x369   : > { %v1167_v55 = vadd.f32 %v1879_v52, %v2598_v54  ;;  %v1158_v56 = vpop.f32.mrb[43].mxu0 }
 0x36a   : > { %v1159_v58 = vadd.f32 %v2598_v54, %v1158_v56 }
 0x36b   : > { %v1641_v39 = vpack.c.bf16 %v1167_v55, %v1164_v53 }
 0x36c   : > { %v1636_v59 = vpack.c.bf16 %v1159_v58, %v1156_v57 }
 0x36d   : > { %1665 = vst [vmem:[%s2605_s29 + $0x68] sm:$0xff] %v1641_v39  }
 0x36e   : > { %1664 = vst [vmem:[%s2605_s29 + $0x60] sm:$0xff] %v1636_v59   ;;  %v1882_v27 = vpop.f32.mrb[44].mxu0 }
 0x36f   : > { %v1171_v60 = vpop.f32.mrb[45].mxu0  ;;  %v1180_v62 = vadd.f32 %v1882_v27, %v2598_v54 }
 0x370   : > { %v1883_v61 = vpop.f32.mrb[46].mxu0  ;;  %v1172_v1 = vadd.f32 %v2598_v54, %v1171_v60 }
 0x371   : > { %v1183_v63 = vadd.f32 %v1883_v61, %v2598_v54  ;;  %v1174_v0 = vpop.f32.mrb[47].mxu0 }
 0x372   : > { %v1175_v2 = vadd.f32 %v2598_v54, %v1174_v0 }
 0x373   : > { %v1651_v3 = vpack.c.bf16 %v1183_v63, %v1180_v62 }
 0x374   : > { %v1646_v4 = vpack.c.bf16 %v1175_v2, %v1172_v1 }
 0x375   : > { %1667 = vst [vmem:[%s2605_s29 + $0x78] sm:$0xff] %v1651_v3  }
 0x376   : > { %1666 = vst [vmem:[%s2605_s29 + $0x70] sm:$0xff] %v1646_v4  }
 0x377   : > { %2135 = shalt.err (!%p2132_p4)
}
 0x378   : > { %s2136_s10 = scalar_lea.hbm %s2654_s13, 2048  ;;  %s2140_s15 = scalar_lea.hbm %s2709_s7, 4096 }
 0x379   : > { %p2137_p9 = scmp.ne.s32.totalorder %s2654_s13, %s2136_s10  ;;  %p2141_p8 = scmp.lt.u32.totalorder %s2654_s13, %s2709_s7 }
 0x37a   : > { %p2142_p13 = scmp.lt.u32.totalorder %s2140_s15, %s2136_s10  ;;  %p2144_p10 = scmp.lt.u32.totalorder %s2136_s10, %s2654_s13 }
 0x37b   : > { %p2138_p0 = pnand %p2137_p9, %p2404_p5 }
 0x37c   : > { %p2143_p6 = por %p2142_p13, %p2141_p8 }
 0x37d   : > { %p2139_p11 = pneg %p2138_p0 }
 0x37e   : > { %p2145_p3 = por %p2144_p10, %p2143_p6 }
 0x380   : > { %p2146_p7 = pnand %p2145_p3, %p2139_p11 }
 0x382   : > { %2149 = shalt.err (!%p2146_p7)
}
 0x383   : > { %s2208_s17 = smov 64   ;;  %s2209_s16 = smov 4  }
 0x384   : > { %1914 = dma.vmem_to_hbm [thread:$0]  (%p2404_p5), %s2656_s8, 2048, %s2654_s13, %s1347_s28, %s2208_s17, %s2208_s17, %s2209_s16  }
 0x385 PF: > { %s2729_s20 = sld [smem:[#allocation15_spill]]  ;;  %s1375_s30 = sand.u32 1, %s2184_s24  }
 0x386   : > { %p2731_p1 = scmp.ge.s32.totalorder %s2196_s27, 2  ;;  %s1376_s9 = scalar_lea.sflag [#allocation4], %s1375_s30 }
 0x38b   : > { %p2730_p12 = scmp.ne.s32.totalorder %s2729_s20, 0 }
 0x38d   : > { %p1931_p2 = pnand %p2731_p1, %p2730_p12 }
 0x38f   : > { %2179 = dma.done.wait (!%p1931_p2), %s1376_s9, 2048  }
 0x390   : > { %2181 = vsyncadd (!%p1931_p2), %s1376_s9, 4294965248  ;;  %p22_p4 = scmp.ge.s32.totalorder %s2390_s22, 4   ;;  %s2732_s24 = smov %s2188_s25 }
 0x391   : > { %s2733_s25 = smov %s2192_s26  ;;  %s2734_s26 = smov %s2400_s18 }
 0x392   : > { %s2735_s27 = smov %s2390_s22  ;;  %24 = sbr.rel (!%p22_p4) target bundleno = 7 (0x7), region = 105 }
 0x399   :  { %1381 = vsyncpa [#allocation3], 1 }
 0x39a   :  { %1383 = vsyncpa [#allocation3 + $0x1], 1 }
 0x39b   :  { %1384 = vsyncpa [#allocation6], 1 }
 0x39c   :  { %1385 = vsyncpa [#allocation9], 1 }
 0x39d   :  { %1386 = vsyncpa [#allocation4], 1 }
 0x39e   :  { %1388 = vsyncpa [#allocation4 + $0x1], 1 }

</bundles_post_ra>
